<compile_context>
chip_gen: v7x
topology: tpu7x:2x2x1
jax: 0.10.0
libtpu: 0.0.40
codegen_flags: <defaults>
</compile_context>

<pallas_src>
import functools

import jax
import jax.numpy as jnp
from jax.experimental import pallas as pl
from jax.experimental.pallas import tpu as pltpu


_TARGET_TILE_BYTES = 2 * 1024 * 1024   # ~2 MiB per input tile (>=85% of roofline)
_VMEM_LIMIT_BYTES = 32 * 1024 * 1024   # headroom for compiler temporaries;
                                       # safe on v5e/v6e (128 MiB) and v7x (64 MiB)


def _round_down(x, m):
    return (x // m) * m


def _choose_tile(total, bytes_per_unit, align):
    """Tile length along one axis.

    Targets ~_TARGET_TILE_BYTES per input tile and guarantees >= 2 grid blocks
    whenever the axis is splittable at layout granularity, so a "parallel"
    grid axis can shard across v7x's two TensorCores (one extra ~0.35us grid
    step is noise on single-TC v5e/v6e).
    """
    if total < 2 * align:
        return total                                   # too small to split
    tile = max(align, _round_down(_TARGET_TILE_BYTES // max(bytes_per_unit, 1), align))
    half = _round_down(total // 2, align)              # >= align by the guard above
    tile = min(tile, half)
    return max(align, min(tile, total))


def _compiler_params(semantics):
    # "parallel" is the standard megacore-sharding mechanism; if a target
    # build does not shard it across v7x's two TCs, switch to
    # pltpu.CORE_PARALLEL on the row axis.
    return pltpu.CompilerParams(dimension_semantics=semantics,
                                vmem_limit_bytes=_VMEM_LIMIT_BYTES)


# ------------------------------ kernels -------------------------------------


def _ln_rows_kernel(x_ref, w_ref, b_ref, o_ref, *, eps):
    # x_ref: (TM, C) -- normalize over the last (lane) dim.
    x = x_ref[...].astype(jnp.float32)
    mean = jnp.mean(x, axis=-1, keepdims=True)
    xc = x - mean
    var = jnp.mean(xc * xc, axis=-1, keepdims=True)
    inv = jax.lax.rsqrt(var + eps)
    o_ref[...] = (xc * inv * w_ref[...] + b_ref[...]).astype(o_ref.dtype)


def _seg_mean_dot(x_f32, avg_bf16):
    # 2-pass hi/lo bf16 split of the f32 operand; avg entries (0, 1/C with
    # C | 128) are exact in bf16, so both MXU passes are native single-pass
    # bf16 matmuls with f32 accumulation.  Relative error ~2^-17.
    hi = x_f32.astype(jnp.bfloat16)
    lo = (x_f32 - hi.astype(jnp.float32)).astype(jnp.bfloat16)
    return (jnp.dot(hi, avg_bf16, preferred_element_type=jnp.float32)
            + jnp.dot(lo, avg_bf16, preferred_element_type=jnp.float32))


def _ln_rows_packed_kernel(x_ref, w_ref, b_ref, o_ref, *, eps, c):
    # x_ref: (TM, 128) with G = 128//c original rows packed per 128-lane row.
    # Per-row mean/var become segmented reductions done on the otherwise-idle
    # MXU via a block-diagonal averaging matrix built in-kernel (no HBM input
    # stream, no double-buffered VMEM for it).
    l = x_ref.shape[-1]
    rs = jax.lax.broadcasted_iota(jnp.int32, (l, l), 0) // c
    cs = jax.lax.broadcasted_iota(jnp.int32, (l, l), 1) // c
    avg = jnp.where(rs == cs, 1.0 / c, 0.0).astype(jnp.bfloat16)   # exact: c | 128

    x = x_ref[...].astype(jnp.float32)
    mean = _seg_mean_dot(x, avg)
    xc = x - mean
    var = _seg_mean_dot(xc * xc, avg)        # two-pass form; no E[x^2]-mean^2
    inv = jax.lax.rsqrt(var + eps)
    o_ref[...] = (xc * inv * w_ref[...] + b_ref[...]).astype(o_ref.dtype)


def _ln_cfirst_kernel(x_ref, w_ref, b_ref, o_ref, *, eps):
    # x_ref: (C, T) -- normalize over the channel (sublane) axis; the lane axis
    # holds spatial positions, so loads/stores stay lane-dense with no
    # transposes in the wrapper.  (Batch dim is squeezed out of the block.)
    x = x_ref[...].astype(jnp.float32)
    mean = jnp.mean(x, axis=0, keepdims=True)
    xc = x - mean
    var = jnp.mean(xc * xc, axis=0, keepdims=True)
    inv = jax.lax.rsqrt(var + eps)
    o_ref[...] = (xc * inv * w_ref[...] + b_ref[...]).astype(o_ref.dtype)


# ----------------------------- pallas wrappers -------------------------------


def _ln_rows_plain(x2d, w_f32, b_f32, eps):
    rows, c = x2d.shape
    sub_align = max(8, 32 // x2d.dtype.itemsize)
    tm = _choose_tile(rows, c * x2d.dtype.itemsize, sub_align)
    return pl.pallas_call(
        functools.partial(_ln_rows_kernel, eps=eps),
        out_shape=jax.ShapeDtypeStruct((rows, c), x2d.dtype),
        grid_spec=pltpu.PrefetchScalarGridSpec(
            num_scalar_prefetch=0,
            grid=(pl.cdiv(rows, tm),),
            in_specs=[
                pl.BlockSpec((tm, c), lambda i: (i, 0)),
                pl.BlockSpec((1, c), lambda i: (0, 0)),
                pl.BlockSpec((1, c), lambda i: (0, 0)),
            ],
            out_specs=pl.BlockSpec((tm, c), lambda i: (i, 0)),
        ),
        compiler_params=_compiler_params(("parallel",)),
    )(x2d, w_f32.reshape(1, c), b_f32.reshape(1, c))


def _ln_rows_packed(x2d, w_f32, b_f32, eps):
    # Requires c | 128 and rows % g == 0 (g = 128 // c): G rows fold into one
    # fully dense 128-lane row via a free reshape of the contiguous array.
    rows, c = x2d.shape
    g = 128 // c
    rows_p = rows // g
    xp = x2d.reshape(rows_p, 128)
    wp = jnp.tile(w_f32, g).reshape(1, 128)
    bp = jnp.tile(b_f32, g).reshape(1, 128)
    sub_align = max(8, 32 // x2d.dtype.itemsize)
    tm = _choose_tile(rows_p, 128 * x2d.dtype.itemsize, sub_align)
    out = pl.pallas_call(
        functools.partial(_ln_rows_packed_kernel, eps=eps, c=c),
        out_shape=jax.ShapeDtypeStruct((rows_p, 128), x2d.dtype),
        grid_spec=pltpu.PrefetchScalarGridSpec(
            num_scalar_prefetch=0,
            grid=(pl.cdiv(rows_p, tm),),
            in_specs=[
                pl.BlockSpec((tm, 128), lambda i: (i, 0)),
                pl.BlockSpec((1, 128), lambda i: (0, 0)),
                pl.BlockSpec((1, 128), lambda i: (0, 0)),
            ],
            out_specs=pl.BlockSpec((tm, 128), lambda i: (i, 0)),
        ),
        compiler_params=_compiler_params(("parallel",)),
    )(xp, wp, bp)
    return out.reshape(rows, c)


def _ln_channels_last(x2d, weight, bias, eps):
    """Row-wise LayerNorm over the last dim of a (rows, C) array."""
    rows, c = x2d.shape
    w = weight.astype(jnp.float32)
    b = bias.astype(jnp.float32)

    pack = (c < 128) and (128 % c == 0)
    if not pack:
        # c >= 128 (dense or near-dense lanes) or c does not divide 128
        # (e.g. 96): plain path.  See header for why lcm-packing is not used.
        return _ln_rows_plain(x2d, w, b, eps)

    g = 128 // c
    rows_main = _round_down(rows, g)
    if rows_main == rows:
        return _ln_rows_packed(x2d, w, b, eps)
    if rows_main == 0:
        return _ln_rows_plain(x2d, w, b, eps)
    # Keep the bulk on the lane-dense packed path; only the <= g-1 leftover
    # rows take the narrow plain path.  The slice + concatenate cost one extra
    # pass over the data, still cheaper than running 100% of the tensor at
    # c/128 lane utilization with masked stores.
    main = _ln_rows_packed(x2d[:rows_main], w, b, eps)
    tail = _ln_rows_plain(x2d[rows_main:], w, b, eps)
    return jnp.concatenate([main, tail], axis=0)


def _ln_channels_first(x3d, weight, bias, eps):
    """LayerNorm over the channel axis of a (B, C, HW) array (no transposes)."""
    bsz, c, hw = x3d.shape
    t_hw = _choose_tile(hw, c * x3d.dtype.itemsize, 128)
    w2d = weight.astype(jnp.float32).reshape(c, 1)
    b2d = bias.astype(jnp.float32).reshape(c, 1)
    return pl.pallas_call(
        functools.partial(_ln_cfirst_kernel, eps=eps),
        out_shape=jax.ShapeDtypeStruct((bsz, c, hw), x3d.dtype),
        grid_spec=pltpu.PrefetchScalarGridSpec(
            num_scalar_prefetch=0,
            grid=(bsz, pl.cdiv(hw, t_hw)),
            in_specs=[
                pl.BlockSpec((None, c, t_hw), lambda bi, j: (bi, 0, j)),
                pl.BlockSpec((c, 1), lambda bi, j: (0, 0)),
                pl.BlockSpec((c, 1), lambda bi, j: (0, 0)),
            ],
            out_specs=pl.BlockSpec((None, c, t_hw), lambda bi, j: (bi, 0, j)),
        ),
        compiler_params=_compiler_params(("parallel", "parallel")),
    )(x3d, w2d, b2d)


# ------------------------------- module --------------------------------------


class LayerNorm:
    """Pallas port of the ConvNeXt LayerNorm (channels_last / channels_first)."""

    def __init__(self, normalized_shape, eps=1e-6, data_format="channels_last"):
        if data_format not in ("channels_last", "channels_first"):
            raise NotImplementedError
        # deterministic init, same as nn.Parameter(torch.ones/zeros)
        self.weight = jnp.ones((normalized_shape,), dtype=jnp.float32)
        self.bias = jnp.zeros((normalized_shape,), dtype=jnp.float32)
        self.eps = float(eps)
        self.data_format = data_format
        self.normalized_shape = (normalized_shape,)

    def __call__(self, x):
        c = self.normalized_shape[0]
        if self.data_format == "channels_last":
            # x: (..., C) -- normalize over the last dim.
            orig_shape = x.shape
            assert orig_shape[-1] == c
            out = _ln_channels_last(x.reshape(-1, c), self.weight, self.bias, self.eps)
            return out.reshape(orig_shape)
        else:
            # channels_first: x is (B, C, H, W), normalize over dim 1.
            assert x.ndim == 4 and x.shape[1] == c
            b, _, h, w = x.shape
            x3d = x.reshape(b, c, h * w)           # free reshape (contiguous)
            out = _ln_channels_first(x3d, self.weight, self.bias, self.eps)
            return out.reshape(b, c, h, w)


# ------------------------------ references -----------------------------------


def _reference_channels_first(x, weight, bias, eps):
    u = x.mean(1, keepdims=True)
    s = ((x - u) ** 2).mean(1, keepdims=True)
    xn = (x - u) / jnp.sqrt(s + eps)
    return weight[None, :, None, None] * xn + bias[None, :, None, None]


def _reference_channels_last(x, weight, bias, eps):
    u = x.mean(-1, keepdims=True)
    s = ((x - u) ** 2).mean(-1, keepdims=True)
    xn = (x - u) / jnp.sqrt(s + eps)
    return weight * xn + bias


if __name__ == "__main__":
    key = jax.random.PRNGKey(0)
    k1, k2, k3, k4 = jax.random.split(key, 4)

    B, C, H, W = 2, 32, 16, 16

    # channels_first: (B, C, H, W)
    x_cf = jax.random.normal(k1, (B, C, H, W), dtype=jnp.float32)
    ln_cf = LayerNorm(C, eps=1e-6, data_format="channels_first")
    ln_cf.weight = 1.0 + 0.01 * jnp.arange(C, dtype=jnp.float32)
    ln_cf.bias = 0.1 * jnp.arange(C, dtype=jnp.float32)
    y_cf = jax.block_until_ready(ln_cf(x_cf))
    ref_cf = _reference_channels_first(x_cf, ln_cf.weight, ln_cf.bias, ln_cf.eps)
    assert y_cf.shape == x_cf.shape
    assert jnp.allclose(y_cf, ref_cf, atol=1e-4, rtol=1e-4)

    # channels_last, packed path (rows % g == 0): (B, H, W, C)
    x_cl = jax.random.normal(k2, (B, H, W, C), dtype=jnp.float32)
    ln_cl = LayerNorm(C, eps=1e-6, data_format="channels_last")
    ln_cl.weight = 1.0 + 0.01 * jnp.arange(C, dtype=jnp.float32)
    ln_cl.bias = 0.1 * jnp.arange(C, dtype=jnp.float32)
    y_cl = jax.block_until_ready(ln_cl(x_cl))
    ref_cl = _reference_channels_last(x_cl, ln_cl.weight, ln_cl.bias, ln_cl.eps)
    assert y_cl.shape == x_cl.shape
    assert jnp.allclose(y_cl, ref_cl, atol=1e-4, rtol=1e-4)

    # channels_last, packed bulk + ragged remainder (rows = 15, g = 4)
    x_odd = jax.random.normal(k3, (1, 3, 5, C), dtype=jnp.float32)
    y_odd = jax.block_until_ready(ln_cl(x_odd))
    ref_odd = _reference_channels_last(x_odd, ln_cl.weight, ln_cl.bias, ln_cl.eps)
    assert jnp.allclose(y_odd, ref_odd, atol=1e-4, rtol=1e-4)

    # channels_last, plain path (C = 96 does not divide 128)
    C96 = 96
    x96 = jax.random.normal(k4, (2, 4, 4, C96), dtype=jnp.float32)
    ln96 = LayerNorm(C96, eps=1e-6, data_format="channels_last")
    ln96.weight = 1.0 + 0.01 * jnp.arange(C96, dtype=jnp.float32)
    ln96.bias = 0.1 * jnp.arange(C96, dtype=jnp.float32)
    y96 = jax.block_until_ready(ln96(x96))
    ref96 = _reference_channels_last(x96, ln96.weight, ln96.bias, ln96.eps)
    assert jnp.allclose(y96, ref96, atol=1e-4, rtol=1e-4)

    print("KERNEL_OK")
</pallas_src>

<mosaic_0001>
module attributes {stable_mosaic.version = 11 : i64} {
  func.func @_ln_cfirst_kernel(%arg0: i32, %arg1: i32, %arg2: memref<1x32x128xf32, #tpu.memory_space<vmem>>, %arg3: memref<32x1xf32, #tpu.memory_space<vmem>>, %arg4: memref<32x1xf32, #tpu.memory_space<vmem>>, %arg5: memref<1x32x128xf32, #tpu.memory_space<vmem>>) attributes {dimension_semantics = [#tpu.dimension_semantics<parallel>, #tpu.dimension_semantics<parallel>], iteration_bounds = array<i64: 2, 2>, scalar_prefetch = 0 : i64, scratch_operands = 0 : i64, tpu.core_type = #tpu.core_type<tc>, window_params = [{transform_indices = @transform_0, window_bounds = array<i64: 1, 32, 128>}, {pipeline_mode = #tpu.pipeline_mode<synchronous>, transform_indices = @transform_1, window_bounds = array<i64: 32, 1>}, {pipeline_mode = #tpu.pipeline_mode<synchronous>, transform_indices = @transform_2, window_bounds = array<i64: 32, 1>}, {transform_indices = @transform_3, window_bounds = array<i64: 1, 32, 128>}]} {
    %c0 = arith.constant 0 : index
    %c0_0 = arith.constant 0 : index
    %c0_1 = arith.constant 0 : index
    %0 = vector.load %arg2[%c0, %c0_0, %c0_1] : memref<1x32x128xf32, #tpu.memory_space<vmem>>, vector<1x32x128xf32>
    %1 = vector.shape_cast %0 : vector<1x32x128xf32> to vector<32x128xf32>
    %cst = arith.constant dense<0.000000e+00> : vector<128xf32>
    %2 = vector.multi_reduction <add>, %1, %cst [0] : vector<32x128xf32> to vector<128xf32>
    %3 = vector.shape_cast %2 : vector<128xf32> to vector<1x128xf32>
    %cst_2 = arith.constant 3.200000e+01 : f32
    %4 = vector.broadcast %cst_2 : f32 to vector<1x128xf32>
    %5 = arith.divf %3, %4 : vector<1x128xf32>
    %6 = vector.broadcast %5 : vector<1x128xf32> to vector<32x128xf32>
    %7 = arith.subf %1, %6 : vector<32x128xf32>
    %8 = arith.mulf %7, %7 : vector<32x128xf32>
    %cst_3 = arith.constant dense<0.000000e+00> : vector<128xf32>
    %9 = vector.multi_reduction <add>, %8, %cst_3 [0] : vector<32x128xf32> to vector<128xf32>
    %10 = vector.shape_cast %9 : vector<128xf32> to vector<1x128xf32>
    %cst_4 = arith.constant 3.200000e+01 : f32
    %11 = vector.broadcast %cst_4 : f32 to vector<1x128xf32>
    %12 = arith.divf %10, %11 : vector<1x128xf32>
    %cst_5 = arith.constant 9.99999997E-7 : f32
    %13 = vector.broadcast %cst_5 : f32 to vector<1x128xf32>
    %14 = arith.addf %12, %13 : vector<1x128xf32>
    %15 = math.rsqrt %14 : vector<1x128xf32>
    %16 = vector.broadcast %15 : vector<1x128xf32> to vector<32x128xf32>
    %17 = arith.mulf %7, %16 : vector<32x128xf32>
    %c0_6 = arith.constant 0 : index
    %c0_7 = arith.constant 0 : index
    %18 = vector.load %arg3[%c0_6, %c0_7] : memref<32x1xf32, #tpu.memory_space<vmem>>, vector<32x1xf32>
    %19 = vector.broadcast %18 : vector<32x1xf32> to vector<32x128xf32>
    %20 = arith.mulf %17, %19 : vector<32x128xf32>
    %c0_8 = arith.constant 0 : index
    %c0_9 = arith.constant 0 : index
    %21 = vector.load %arg4[%c0_8, %c0_9] : memref<32x1xf32, #tpu.memory_space<vmem>>, vector<32x1xf32>
    %22 = vector.broadcast %21 : vector<32x1xf32> to vector<32x128xf32>
    %23 = arith.addf %20, %22 : vector<32x128xf32>
    %c0_10 = arith.constant 0 : index
    %c0_11 = arith.constant 0 : index
    %c0_12 = arith.constant 0 : index
    %24 = vector.load %arg5[%c0_10, %c0_11, %c0_12] : memref<1x32x128xf32, #tpu.memory_space<vmem>>, vector<1x32x128xf32>
    %25 = vector.shape_cast %24 : vector<1x32x128xf32> to vector<32x128xf32>
    %26 = vector.shape_cast %23 : vector<32x128xf32> to vector<1x32x128xf32>
    tpu.vector_store %arg5[%c0_10, %c0_11, %c0_12], %26 {strides = array<i32>} : memref<1x32x128xf32, #tpu.memory_space<vmem>>, vector<1x32x128xf32>,
    return
  }
  func.func @transform_0(%arg0: i32, %arg1: i32) -> (i32, i32, i32) {
    %c0_i32 = arith.constant 0 : i32
    %c0_i32_0 = arith.constant 0 : i32
    return %arg0, %c0_i32, %arg1 : i32, i32, i32
  }
  func.func @transform_1(%arg0: i32, %arg1: i32) -> (i32, i32) {
    %c0_i32 = arith.constant 0 : i32
    %c0_i32_0 = arith.constant 0 : i32
    %c0_i32_1 = arith.constant 0 : i32
    return %c0_i32, %c0_i32_0 : i32, i32
  }
  func.func @transform_2(%arg0: i32, %arg1: i32) -> (i32, i32) {
    %c0_i32 = arith.constant 0 : i32
    %c0_i32_0 = arith.constant 0 : i32
    %c0_i32_1 = arith.constant 0 : i32
    return %c0_i32, %c0_i32_0 : i32, i32
  }
  func.func @transform_3(%arg0: i32, %arg1: i32) -> (i32, i32, i32) {
    %c0_i32 = arith.constant 0 : i32
    %c0_i32_0 = arith.constant 0 : i32
    return %arg0, %c0_i32, %arg1 : i32, i32, i32
  }
}

</mosaic_0001>

<bundles_post_ra>
// kernel: tpu_custom_call.1
= control target key start
LH: loop header
LB: loop body
LE: loop exit
PB: predicated region body
PF: predicated region fallthrough
CT: control target
= control target key end

     0   :  { %8 = vsyncpa [#allocation3], 0  ;;  %s894_s0 = inlined_call_operand.hbm [shape: f32[2,32,256], index: 0, kind: input, shape index: {}]   ;;  %s895_s1 = inlined_call_operand.vmem [shape: f32[32,1], index: 1, kind: input, shape index: {}]   ;;  %s896_s2 = inlined_call_operand.vmem [shape: f32[32,1], index: 2, kind: input, shape index: {}]   ;;  %s897_s3 = inlined_call_operand.hbm [shape: f32[2,32,256], index: 3, kind: output, shape index: {}]  }
   0x1   :  { %10 = vsyncpa [#allocation3 + $0x1], 0 }
   0x2   :  { %11 = vsyncpa [#allocation4], 0 }
   0x3   :  { %13 = vsyncpa [#allocation4 + $0x1], 0  ;;  %s671_s12 = smov 0   ;;  %s673_s13 = smov 0  }
   0x4   :  { %s675_s14 = smov 0   ;;  %s677_s15 = smov 0  }
   0x5   :  { %s679_s16 = smov 0   ;;  %s681_s17 = smov 0  }
   0x6   :  { %s683_s18 = smov 0   ;;  %s685_s19 = smov 0  }
   0x7 LB: > { %s408_s20 = sadd.s32 4294967295, %s640_s19   ;;  %s409_s21 = sadd.s32 4294967294, %s640_s19   ;;  %s640_s19 = sphi %s685_s19, %s19_s19   ;;  %s636_s18 = sphi %s683_s18, %s915_s18   ;;  %s632_s17 = sphi %s681_s17, %s914_s17   ;;  %s628_s16 = sphi %s679_s16, %s913_s16   ;;  %s624_s15 = sphi %s677_s15, %s912_s15   ;;  %s620_s14 = sphi %s675_s14, %s911_s14   ;;  %s616_s13 = sphi %s673_s13, %s910_s13   ;;  %s612_s12 = sphi %s671_s12, %s909_s12  }
   0x8   : > { %s28_s22 = sadd.s32 1, %s632_s17  ;;  %s31_s23 = sadd.s32 1, %s636_s18 }
   0x9   : > { %p29_p0 = scmp.ge.s32.totalorder %s28_s22, 2  ;;  %s40_s24 = sadd.s32 1, %s620_s14 }
   0xa   : > { %p47_p1 = scmp.ne.s32.totalorder %s620_s14, %s616_s13  ;;  %p48_p2 = scmp.eq.s32.totalorder %s640_s19, 0 }
   0xb   : > { %s917_s22 = smov (%p29_p0, %s28_s22), 0  ;;  %s919_s23 = smov (!%p29_p0, %s31_s23), %s636_s18 }
   0xc   : > { %s36_s25 = ssub.s32 %s632_s17, %s917_s22  ;;  %p724_p3 = por %p48_p2, %p47_p1 }
   0xd   : > { %p33_p4 = scmp.ge.s32.totalorder %s919_s23, 2  ;;  %p53_p5 = scmp.ne.s32.totalorder %s616_s13, %s612_s12 }
   0xe   : > { %p54_p6 = scmp.eq.s32.totalorder %s408_s20, 0  ;;  %p121_p7 = scmp.eq.s32.totalorder %s408_s20, 3 }
   0xf   : > { %s921_s23 = smov (%p33_p4, %s919_s23), 0  ;;  %p127_p10 = scmp.eq.s32.totalorder %s409_s21, 3 }
  0x10   : > { %901 = sst [smem:[#allocation8_spill]] %s921_s23  ;;  %p732_p8 = por %p54_p6, %p53_p5 }
  0x11   : > { %p736_p9 = por %p121_p7, %p47_p1  ;;  %s35_s29 = ssub.s32 %s636_s18, %s921_s23 }
  0x12   : > { %s37_s30 = sor.u32 %s36_s25, %s35_s29  ;;  %p742_p12 = por %p127_p10, %p53_p5 }
  0x13   : > { %s903_s28 = scalar_select %p736_p9, 1, 0 }
  0x14   : > { %p38_p11 = scmp.eq.s32.totalorder %s37_s30, 0  ;;  %p435_p13 = scmp.lt.s32.totalorder %s640_s19, 4 }
  0x15   : > { %s904_s4 = scalar_select %p742_p12, 1, 0 }
  0x16   : > { %s153_s5 = sand.u32 1, %s620_s14   ;;  %s413_s8 = sshll.u32 %s636_s18, 3 }
  0x17   : > { %s749_s6 = scalar_select %p38_p11, %s620_s14, %s40_s24  }
  0x18   : > { %s412_s7 = sshll.u32 %s153_s5, 5  ;;  %s162_s9 = sadd.s32 %s632_s17, %s413_s8 }
  0x19   : > { %s157_s10 = scalar_lea.vmem [#allocation2], %s412_s7  ;;  %s414_s20 = sshll.u32 %s162_s9, 7 }
  0x1a   : > { %s165_s11 = sshll.u32 %s157_s10, 4  ;;  %s758_s25 = scalar_lea.hbm %s894_s0, %s414_s20  ;;  %s753_s11 = int_to_ptr.vmem [resolvable:$true] %s165_s11 }
  0x1b   : > { %p762_p0 = pnand %p435_p13, %p724_p3  ;;  %s766_s29 = scalar_lea.sflag [#allocation3], %s153_s5 }
  0x1c   : > { %s512_s30 = scalar_lea.hbm %s758_s25, 512  ;;  %s517_s7 = scalar_lea.hbm %s894_s0, 2048 }
  0x1d   : > { %p513_p1 = scmp.ne.s32.totalorder %s758_s25, %s512_s30  ;;  %p514_p2 = pneg %p762_p0 }
  0x1e   : > { %p518_p3 = scmp.lt.u32.totalorder %s758_s25, %s894_s0  ;;  %p519_p6 = scmp.lt.u32.totalorder %s517_s7, %s512_s30 }
  0x1f   : > { %p515_p4 = pnand %p514_p2, %p513_p1  ;;  %p521_p10 = scmp.lt.u32.totalorder %s512_s30, %s758_s25 }
  0x20   : > { %p520_p7 = por %p519_p6, %p518_p3 }
  0x21   : > { %p516_p5 = pneg %p515_p4 }
  0x22   : > { %p522_p11 = por %p521_p10, %p520_p7 }
  0x24   : > { %p523_p13 = pnand %p522_p11, %p516_p5 }
  0x26   : > { %526 = shalt.err (!%p523_p13)
}
  0x27   : > { %s527_s5 = scalar_lea.vmem %s753_s11, 512  ;;  %s642_s10 = smov [#allocation2]  }
  0x28   : > { %p528_p1 = scmp.ne.s32.totalorder %s753_s11, %s527_s5  ;;  %s532_s20 = sshll.u32 %s642_s10, 4  ;;  %s533_s20 = int_to_ptr.vmem [resolvable:$false] %s532_s20 }
  0x29   : > { %s534_s21 = scalar_lea.vmem %s533_s20, 1024  ;;  %p535_p9 = scmp.lt.s32.totalorder %s753_s11, %s533_s20 }
  0x2a   : > { %p530_p4 = pnand %p528_p1, %p514_p2  ;;  %p536_p3 = scmp.lt.s32.totalorder %s534_s21, %s527_s5 }
  0x2c   : > { %p531_p12 = pneg %p530_p4  ;;  %p537_p6 = por %p536_p3, %p535_p9 }
  0x2e   : > { %p538_p7 = pnand %p537_p6, %p531_p12 }
  0x30   : > { %541 = shalt.err (!%p538_p7)
}
  0x31   : > { %s643_s30 = smov 256   ;;  %s644_s23 = smov 128  }
  0x32   : > { %s645_s26 = smov 8   ;;  %p415_p2 = scmp.ge.s32.totalorder %s640_s19, 1 }
  0x33   : > { %430 = dma.hbm_to_vmem [thread:$0]  (!%p762_p0), %s758_s25, 512, %s753_s11, %s766_s29, %s643_s30, %s644_s23, %s645_s26  }
  0x34   : > { %p173_p5 = scmp.lt.s32.totalorder %s640_s19, 5 }
  0x36   : > { %p174_p10 = pnand %p415_p2, %p173_p5 }
  0x37   : > { %s797_s7 = sand.u32 (!%p174_p10), 1, %s616_s13  }
  0x38   : > { %177 = sbr.rel (%p174_p10) target bundleno = 224 (0xe0), region = 32  ;;  %s416_s8 = sshll.u32 (!%p174_p10), %s797_s7, 5 }
  0x39   : > { %s180_s9 = scalar_lea.sflag (!%p174_p10), [#allocation3], %s797_s7  ;;  %s183_s5 = scalar_lea.vmem (!%p174_p10), [#allocation2], %s416_s8 }
  0x3f   : > { %603 = dma.done.wait (%p732_p8), %s180_s9, 512  }
  0x40   : > { %605 = vsyncadd (%p732_p8), %s180_s9, 4294966784  ;;  %v646_v0 = vmov 0   ;;  %v247_v1 = vld [vmem:[%s895_s1 + $0x10] sm:$0xff]  ;;  %v245_v2 = vld [vmem:[%s895_s1] sm:$0xff]  ;;  %s205_s20 = scalar_lea.vmem [#allocation5], %s416_s8  ;;  %s306_s30 = scalar_lea.sflag [#allocation4], %s797_s7 }
  0x41   : > { %509 = vset.pattern.permute.xlu1 %v646_v0  ;;  %508 = vset.pattern.permute.xlu0 %v646_v0  ;;  %v248_v3 = vld [vmem:[%s895_s1 + $0x18] sm:$0xff]  ;;  %v246_v4 = vld [vmem:[%s895_s1 + $0x8] sm:$0xff]  ;;  %v273_v6 = vld [vmem:[%s896_s2] sm:$0xff]  ;;  %s320_s21 = sshll.u32 %s205_s20, 4  ;;  %p906_p9 = scmp.ne.s32.totalorder %s903_s28, 0  ;;  %s835_s21 = int_to_ptr.vmem [resolvable:$true] %s320_s21 }
  0x42   : > { %261 = vperm.xlu1 %509, %v247_v1   ;;  %251 = vperm.xlu0 %508, %v245_v2   ;;  %v274_v5 = vld [vmem:[%s896_s2 + $0x8] sm:$0xff]  ;;  %v276_v7 = vld [vmem:[%s896_s2 + $0x18] sm:$0xff]  ;;  %v275_v8 = vld [vmem:[%s896_s2 + $0x10] sm:$0xff]  ;;  %s542_s23 = scalar_lea.vmem %s835_s21, 512  ;;  %s647_s26 = smov [#allocation5]  }
  0x43   : > { %v206_v9 = vld [vmem:[%s183_s5] sm:$0xff]  ;;  %v207_v10 = vld [vmem:[%s183_s5 + $0x8] sm:$0xff]  ;;  %v208_v12 = vld [vmem:[%s183_s5 + $0x10] sm:$0xff]  ;;  %p543_p8 = scmp.ne.s32.totalorder %s835_s21, %s542_s23  ;;  %s546_s9 = sshll.u32 %s647_s26, 4  ;;  %s547_s9 = int_to_ptr.vmem [resolvable:$false] %s546_s9 }
  0x44   : > { %v210_v11 = vadd.f32 %v207_v10, %v206_v9  ;;  %v209_v14 = vld [vmem:[%s183_s5 + $0x18] sm:$0xff]  ;;  %s419_s5 = sshll.u32 %s628_s16, 3  ;;  %s548_s11 = scalar_lea.vmem %s547_s9, 1024 }
  0x45   : > { %s317_s10 = sadd.s32 %s624_s15, %s419_s5  ;;  %p544_p12 = pnand %p543_p8, %p906_p9 }
  0x46   : > { %266 = vperm.xlu1 %509, %v248_v3   ;;  %256 = vperm.xlu0 %508, %v246_v4   ;;  %v211_v13 = vadd.f32 %v210_v11, %v208_v12  ;;  %s420_s27 = sshll.u32 %s317_s10, 7  ;;  %p549_p11 = scmp.lt.s32.totalorder %s835_s21, %s547_s9 }
  0x47   : > { %s840_s8 = scalar_lea.hbm %s897_s3, %s420_s27  ;;  %p545_p0 = pneg %p544_p12 }
  0x48   : > { %v212_v15 = vadd.f32 %v211_v13, %v209_v14  ;;  %p550_p13 = scmp.lt.s32.totalorder %s548_s11, %s542_s23 }
  0x4a   : > { %284 = vperm.xlu1 %509, %v274_v5   ;;  %279 = vperm.xlu0 %508, %v273_v6   ;;  %v213_v16 = vrot.slane %v212_v15, 4  ;;  %p551_p1 = por %p550_p13, %p549_p11 }
  0x4c   : > { %v214_v17 = vadd.f32 %v213_v16, %v212_v15  ;;  %p552_p4 = pnand %p551_p1, %p545_p0 }
  0x4e   : > { %294 = vperm.xlu1 %509, %v276_v7   ;;  %289 = vperm.xlu0 %508, %v275_v8   ;;  %v215_v18 = vrot.slane %v214_v17, 2 }
  0x50   : > { %v216_v19 = vadd.f32 %v215_v18, %v214_v17 }
  0x52   : > { %v217_v20 = vrot.slane %v216_v19, 1 }
  0x54   : > { %v218_v21 = vadd.f32 %v217_v20, %v216_v19 }
  0x56   : > { %v220_v22 = vmul.f32 0.03125, %v218_v21 }
  0x58   : > { %v221_v23 = vsub.f32 %v206_v9, %v220_v22  ;;  %v222_v24 = vsub.f32 %v207_v10, %v220_v22  ;;  %v223_v25 = vsub.f32 %v208_v12, %v220_v22  ;;  %v224_v28 = vsub.f32 %v209_v14, %v220_v22 }
  0x5a   : > { %v225_v26 = vmul.f32 %v221_v23, %v221_v23  ;;  %v226_v27 = vmul.f32 %v222_v24, %v222_v24  ;;  %v227_v29 = vmul.f32 %v223_v25, %v223_v25  ;;  %v228_v31 = vmul.f32 %v224_v28, %v224_v28 }
  0x5c   : > { %v229_v30 = vadd.f32 %v226_v27, %v225_v26 }
  0x5e   : > { %v230_v32 = vadd.f32 %v229_v30, %v227_v29 }
  0x60   : > { %v231_v33 = vadd.f32 %v230_v32, %v228_v31 }
  0x62   : > { %v232_v34 = vrot.slane %v231_v33, 4 }
  0x64   : > { %v233_v35 = vadd.f32 %v232_v34, %v231_v33 }
  0x66   : > { %v234_v36 = vrot.slane %v233_v35, 2 }
  0x68   : > { %v235_v37 = vadd.f32 %v234_v36, %v233_v35 }
  0x6a   : > { %v236_v38 = vrot.slane %v235_v37, 1 }
  0x6c   : > { %v237_v39 = vadd.f32 %v236_v38, %v235_v37 }
  0x6e   : > { %v238_v40 = vmul.f32 0.03125, %v237_v39 }
  0x70   : > { %v239_v41 = vadd.f32 1e-06, %v238_v40 }
  0x72   : > { %510 = vrsqrt.f32 %v239_v41 }
  0x7c   : > { %v511_v42 = vpop.eup %510 }
  0x7d   : > { %v241_v45 = vmul.f32 %v511_v42, %v221_v23  ;;  %v242_v46 = vmul.f32 %v511_v42, %v222_v24  ;;  %v243_v49 = vmul.f32 %v511_v42, %v223_v25  ;;  %v244_v51 = vmul.f32 %v511_v42, %v224_v28 }
  0xc1   : > { %v262_v43 = vpop.permute.xlu1 %261  ;;  %v252_v44 = vpop.permute.xlu0 %251 }
  0xc2   : > { %v269_v50 = vmul.f32 %v252_v44, %v241_v45  ;;  %v271_v57 = vmul.f32 %v262_v43, %v243_v49 }
  0xc5   : > { %v267_v47 = vpop.permute.xlu1 %266  ;;  %v257_v48 = vpop.permute.xlu0 %256 }
  0xc6   : > { %v270_v52 = vmul.f32 %v257_v48, %v242_v46  ;;  %v272_v58 = vmul.f32 %v267_v47, %v244_v51 }
  0xc9   : > { %v285_v53 = vpop.permute.xlu1 %284  ;;  %v280_v54 = vpop.permute.xlu0 %279 }
  0xca   : > { %v298_v55 = vadd.f32 %v285_v53, %v270_v52  ;;  %v297_v56 = vadd.f32 %v280_v54, %v269_v50 }
  0xcc   : > { %302 = vst [vmem:[%s205_s20 + $0x8] sm:$0xff] %v298_v55  ;;  %301 = vst [vmem:[%s205_s20] sm:$0xff] %v297_v56 }
  0xcd   : > { %v295_v59 = vpop.permute.xlu1 %294  ;;  %v290_v60 = vpop.permute.xlu0 %289 }
  0xce   : > { %v300_v61 = vadd.f32 %v295_v59, %v272_v58  ;;  %v299_v62 = vadd.f32 %v290_v60, %v271_v57 }
  0xd0   : > { %304 = vst [vmem:[%s205_s20 + $0x18] sm:$0xff] %v300_v61  ;;  %303 = vst [vmem:[%s205_s20 + $0x10] sm:$0xff] %v299_v62 }
  0xd1   : > { %555 = shalt.err (!%p552_p4)
}
  0xd2   : > { %s556_s25 = scalar_lea.hbm %s840_s8, 512  ;;  %s560_s5 = scalar_lea.hbm %s897_s3, 2048 }
  0xd3   : > { %p557_p3 = scmp.ne.s32.totalorder %s840_s8, %s556_s25  ;;  %p561_p2 = scmp.lt.u32.totalorder %s840_s8, %s897_s3 }
  0xd4   : > { %p562_p5 = scmp.lt.u32.totalorder %s560_s5, %s556_s25  ;;  %p564_p8 = scmp.lt.u32.totalorder %s556_s25, %s840_s8 }
  0xd5   : > { %p558_p6 = pnand %p557_p3, %p906_p9 }
  0xd6   : > { %p563_p10 = por %p562_p5, %p561_p2 }
  0xd7   : > { %p559_p7 = pneg %p558_p6 }
  0xd8   : > { %p565_p12 = por %p564_p8, %p563_p10 }
  0xda   : > { %p566_p0 = pnand %p565_p12, %p559_p7 }
  0xdc   : > { %569 = shalt.err (!%p566_p0)
}
  0xdd   : > { %s648_s27 = smov 128   ;;  %s649_s15 = smov 256  }
  0xde   : > { %s650_s16 = smov 8  }
  0xdf   : > { %425 = dma.vmem_to_hbm [thread:$0]  (%p906_p9), %s835_s21, 512, %s840_s8, %s306_s30, %s648_s27, %s649_s15, %s650_s16  }
  0xe0 PF: > { %p436_p11 = scmp.ge.s32.totalorder %s640_s19, 2  ;;  %s335_s23 = sand.u32 1, %s612_s12  }
  0xe1   : > { %p907_p13 = scmp.ne.s32.totalorder %s904_s4, 0  ;;  %s336_s26 = scalar_lea.sflag [#allocation4], %s335_s23 }
  0xe3   : > { %p432_p1 = pnand %p436_p11, %p907_p13 }
  0xe5   : > { %607 = dma.done.wait (!%p432_p1), %s336_s26, 512  }
  0xe6   : > { %609 = vsyncadd (!%p432_p1), %s336_s26, 4294966784  ;;  %s19_s19 = sadd.s32 1, %s640_s19   ;;  %s908_s28 = sld [smem:[#allocation8_spill]] }
  0xe7   : > { %p16_p4 = scmp.ge.s32.totalorder %s19_s19, 6   ;;  %s909_s12 = smov %s616_s13 }
  0xe8   : > { %s910_s13 = smov %s620_s14  ;;  %s911_s14 = smov %s749_s6 }
  0xe9   : > { %s912_s15 = smov %s632_s17  ;;  %s913_s16 = smov %s636_s18 }
  0xea   : > { %s914_s17 = smov %s917_s22  ;;  %18 = sbr.rel (!%p16_p4) target bundleno = 7 (0x7), region = 77 }
  0xec   : > { %s915_s18 = smov %s908_s28 }
  0xf1   :  { %341 = vsyncpa [#allocation3], 1 }
  0xf2   :  { %343 = vsyncpa [#allocation3 + $0x1], 1 }
  0xf3   :  { %344 = vsyncpa [#allocation4], 1 }
  0xf4   :  { %346 = vsyncpa [#allocation4 + $0x1], 1 }

</bundles_post_ra>
